<compile_context>
chip_gen: v7x
topology: tpu7x:2x2x1
jax: 0.10.0
libtpu: 0.0.40
codegen_flags: <defaults>
</compile_context>

<pallas_src>
import functools
import math

import jax
import jax.numpy as jnp
from jax.experimental import pallas as pl
from jax.experimental.pallas import tpu as pltpu


def _rbf_kernel(d_ref, params_ref, out_ref, *,
                cutoff: float, num_radial: int, pack: int):
    # d_ref:      (TM, pack)       `pack` distances per output row
    # params_ref: (2, pack * R)    row 0: centers tiled; row 1: -widths tiled
    # out_ref:    (TM, pack * R)   lane-dense output tile
    tm, lanes = out_ref.shape

    d = d_ref[...]                                   # (TM, pack) f32
    centers = params_ref[0:1, :]                     # (1, lanes) f32
    neg_widths = params_ref[1:2, :]                  # (1, lanes) f32

    # Expand distances across lane blocks: lane l uses distance column l // R.
    # The iota/compare lives on a single (1, lanes) vreg; only the selects
    # (pack-1 of them) touch full (TM, lanes) vregs.
    d_exp = d[:, 0:1]                                # (TM, 1), broadcasts below
    if pack > 1:
        lane = jax.lax.broadcasted_iota(jnp.int32, (1, lanes), 1)
        for p in range(1, pack):
            d_exp = jnp.where(lane >= p * num_radial, d[:, p:p + 1], d_exp)

    diff = d_exp - centers                           # (TM, lanes)
    rbf = jnp.exp(neg_widths * diff * diff)
    # Fused cutoff mask (no float cast + multiply).
    out = jnp.where(d_exp <= cutoff, rbf, 0.0)
    out_ref[...] = out.astype(out_ref.dtype)


def radial_basis_function(distances: jax.Array,
                          centers: jax.Array,
                          widths: jax.Array,
                          cutoff: float,
                          *,
                          row_tile: int = 4096,
                          out_dtype=jnp.float32) -> jax.Array:
    """Pallas RBF. distances: arbitrary shape; returns distances.shape + (R,)."""
    num_radial = int(centers.shape[0])
    orig_shape = distances.shape
    d_flat = distances.reshape(-1).astype(jnp.float32)
    m = d_flat.shape[0]

    if m == 0:  # empty input guard
        return jnp.zeros((*orig_shape, num_radial), dtype=out_dtype)

    # Pack several distances per output row so the stored last dim is a full
    # multiple of 128 lanes (unmasked vst).  Smallest pack with pack*R % 128 == 0,
    # only when it divides m (so the final reshape is a free contiguous view)
    # and stays cheap for the in-kernel select expansion.
    pack = 1
    if num_radial > 0 and num_radial % 128 != 0:
        cand = 128 // math.gcd(num_radial, 128)
        if 1 < cand <= 8 and m % cand == 0:
            pack = cand
    m_rows = m // pack
    lanes = pack * num_radial

    d2 = d_flat.reshape(m_rows, pack)
    c_tiled = jnp.tile(centers.astype(jnp.float32).reshape(1, num_radial), (1, pack))
    nw_tiled = jnp.tile((-widths).astype(jnp.float32).reshape(1, num_radial), (1, pack))
    params = jnp.concatenate([c_tiled, nw_tiled], axis=0)        # (2, lanes)

    # Tile selection: big tiles (memory-bound), but always >= 2 grid blocks when
    # there is enough work so v7x megacore can split the "parallel" axis.
    if m_rows <= 512:
        tm = m_rows                                  # single block, full extent
    else:
        half = -(-m_rows // 2)                       # ceil(m_rows / 2)
        half8 = -(-half // 8) * 8                    # sublane multiple
        tm = min(row_tile, half8)
        tm = max((tm // 8) * 8, 8)
    grid = (pl.cdiv(m_rows, tm),)

    # VMEM budget: double-buffered output tile + lane-padded d tile (the narrow
    # (tm, pack) block is padded to 128 lanes in VMEM) + params, plus slack.
    out_itemsize = jnp.dtype(out_dtype).itemsize
    lanes_vmem = -(-lanes // 128) * 128
    tm_vmem = -(-tm // 8) * 8
    block_bytes = tm_vmem * (lanes_vmem * out_itemsize + 128 * 4)
    vmem_limit = int(min(max(4 * block_bytes + (2 << 20), 8 << 20), 32 << 20))

    out = pl.pallas_call(
        functools.partial(_rbf_kernel, cutoff=float(cutoff),
                          num_radial=num_radial, pack=pack),
        out_shape=jax.ShapeDtypeStruct((m_rows, lanes), out_dtype),
        grid_spec=pltpu.PrefetchScalarGridSpec(
            num_scalar_prefetch=0,
            grid=grid,
            in_specs=[
                pl.BlockSpec((tm, pack), lambda i: (i, 0)),
                pl.BlockSpec((2, lanes), lambda i: (0, 0)),
            ],
            out_specs=pl.BlockSpec((tm, lanes), lambda i: (i, 0)),
        ),
        compiler_params=pltpu.CompilerParams(
            dimension_semantics=("parallel",),
            vmem_limit_bytes=vmem_limit),
    )(d2, params)

    # (m_rows, pack*R) has the same row-major layout as (..., R): free reshape.
    return out.reshape(*orig_shape, num_radial)


def _reference(distances, centers, widths, cutoff):
    d = distances[..., None].astype(jnp.float32)
    rbf = jnp.exp(-widths.reshape(1, -1) * (d - centers.reshape(1, -1)) ** 2)
    mask = (distances <= cutoff).astype(jnp.float32)[..., None]
    return rbf * mask


if __name__ == "__main__":
    num_radial = 64
    cutoff = 10.0

    # Deterministic parameter init, mirroring the PyTorch __init__.
    centers = jnp.linspace(0.0, cutoff, num_radial, dtype=jnp.float32)
    widths = jnp.ones((num_radial,), dtype=jnp.float32) * 0.5

    key = jax.random.PRNGKey(0)
    k1, k2, k3 = jax.random.split(key, 3)

    # Primary example: [N, E] = [2, 16] distances; some exceed the cutoff so
    # the mask path is exercised.  m even -> packed 128-lane output path.
    distances = jax.random.uniform(k1, (2, 16), dtype=jnp.float32,
                                   minval=0.0, maxval=12.0)
    out = jax.block_until_ready(
        radial_basis_function(distances, centers, widths, cutoff))
    ref = _reference(distances, centers, widths, cutoff)
    assert out.shape == (2, 16, num_radial), out.shape
    assert jnp.allclose(out, ref, atol=1e-5, rtol=1e-5), \
        float(jnp.max(jnp.abs(out - ref)))

    # Odd element count -> pack=1 fallback (R-lane output block).
    d_odd = jax.random.uniform(k2, (3, 5), dtype=jnp.float32,
                               minval=0.0, maxval=12.0)
    out2 = jax.block_until_ready(
        radial_basis_function(d_odd, centers, widths, cutoff))
    ref2 = _reference(d_odd, centers, widths, cutoff)
    assert out2.shape == (3, 5, num_radial), out2.shape
    assert jnp.allclose(out2, ref2, atol=1e-5, rtol=1e-5), \
        float(jnp.max(jnp.abs(out2 - ref2)))

    # Larger case: multi-block grid (>= 2 blocks -> both v7x TensorCores),
    # no input pad / no output slice in the wrapper.
    d_big = jax.random.uniform(k3, (4, 600), dtype=jnp.float32,
                               minval=0.0, maxval=12.0)
    out3 = jax.block_until_ready(
        radial_basis_function(d_big, centers, widths, cutoff))
    ref3 = _reference(d_big, centers, widths, cutoff)
    assert out3.shape == (4, 600, num_radial), out3.shape
    assert jnp.allclose(out3, ref3, atol=1e-5, rtol=1e-5), \
        float(jnp.max(jnp.abs(out3 - ref3)))

    # Opt-in bf16 output fast path (halves store traffic); compute stays f32.
    out_bf16 = jax.block_until_ready(
        radial_basis_function(distances, centers, widths, cutoff,
                              out_dtype=jnp.bfloat16))
    assert out_bf16.dtype == jnp.bfloat16
    assert jnp.allclose(out_bf16.astype(jnp.float32), ref,
                        atol=1.5e-2, rtol=1.5e-2)

    print("KERNEL_OK")
</pallas_src>

<mosaic_0001>
module attributes {stable_mosaic.version = 11 : i64} {
  func.func @_rbf_kernel(%arg0: i32, %arg1: memref<16x2xf32, #tpu.memory_space<vmem>>, %arg2: memref<2x128xf32, #tpu.memory_space<vmem>>, %arg3: memref<16x128xf32, #tpu.memory_space<vmem>>) attributes {dimension_semantics = [#tpu.dimension_semantics<parallel>], iteration_bounds = array<i64: 1>, scalar_prefetch = 0 : i64, scratch_operands = 0 : i64, tpu.core_type = #tpu.core_type<tc>, window_params = [{transform_indices = @transform_0, window_bounds = array<i64: 16, 2>}, {pipeline_mode = #tpu.pipeline_mode<synchronous>, transform_indices = @transform_1, window_bounds = array<i64: 2, 128>}, {transform_indices = @transform_2, window_bounds = array<i64: 16, 128>}]} {
    %c0 = arith.constant 0 : index
    %c0_0 = arith.constant 0 : index
    %0 = vector.load %arg1[%c0, %c0_0] : memref<16x2xf32, #tpu.memory_space<vmem>>, vector<16x2xf32>
    %c0_1 = arith.constant 0 : index
    %c0_2 = arith.constant 0 : index
    %1 = vector.load %arg2[%c0_1, %c0_2] : memref<2x128xf32, #tpu.memory_space<vmem>>, vector<1x128xf32>
    %c1 = arith.constant 1 : index
    %c0_3 = arith.constant 0 : index
    %2 = vector.load %arg2[%c1, %c0_3] : memref<2x128xf32, #tpu.memory_space<vmem>>, vector<1x128xf32>
    %3 = vector.extract_strided_slice %0 {offsets = [0, 0], sizes = [16, 1], strides = [1, 1]} : vector<16x2xf32> to vector<16x1xf32>
    %4 = tpu.iota {dimensions = array<i32: 1>} : vector<1x128xi32>
    %c64_i32 = arith.constant 64 : i32
    %5 = vector.broadcast %c64_i32 : i32 to vector<1x128xi32>
    %6 = arith.cmpi sge, %4, %5 : vector<1x128xi32>
    %7 = vector.extract_strided_slice %0 {offsets = [0, 1], sizes = [16, 1], strides = [1, 1]} : vector<16x2xf32> to vector<16x1xf32>
    %8 = vector.shape_cast %6 : vector<1x128xi1> to vector<1x128xi1>
    %9 = vector.broadcast %8 : vector<1x128xi1> to vector<16x128xi1>
    %10 = vector.shape_cast %7 : vector<16x1xf32> to vector<16x1xf32>
    %11 = vector.broadcast %10 : vector<16x1xf32> to vector<16x128xf32>
    %12 = vector.shape_cast %3 : vector<16x1xf32> to vector<16x1xf32>
    %13 = vector.broadcast %12 : vector<16x1xf32> to vector<16x128xf32>
    %14 = arith.select %9, %11, %13 : vector<16x128xi1>, vector<16x128xf32>
    %15 = vector.broadcast %1 : vector<1x128xf32> to vector<16x128xf32>
    %16 = arith.subf %14, %15 : vector<16x128xf32>
    %17 = vector.broadcast %2 : vector<1x128xf32> to vector<16x128xf32>
    %18 = arith.mulf %17, %16 : vector<16x128xf32>
    %19 = arith.mulf %18, %16 : vector<16x128xf32>
    %20 = math.exp %19 : vector<16x128xf32>
    %cst = arith.constant 1.000000e+01 : f32
    %21 = vector.broadcast %cst : f32 to vector<16x128xf32>
    %22 = arith.cmpf ole, %14, %21 : vector<16x128xf32>
    %cst_4 = arith.constant 0.000000e+00 : f32
    %23 = vector.broadcast %cst_4 : f32 to vector<16x128xf32>
    %24 = arith.select %22, %20, %23 : vector<16x128xi1>, vector<16x128xf32>
    %c0_5 = arith.constant 0 : index
    %c0_6 = arith.constant 0 : index
    %25 = vector.load %arg3[%c0_5, %c0_6] : memref<16x128xf32, #tpu.memory_space<vmem>>, vector<16x128xf32>
    tpu.vector_store %arg3[%c0_5, %c0_6], %24 {strides = array<i32>} : memref<16x128xf32, #tpu.memory_space<vmem>>, vector<16x128xf32>,
    return
  }
  func.func @transform_0(%arg0: i32) -> (i32, i32) {
    %c0_i32 = arith.constant 0 : i32
    %c0_i32_0 = arith.constant 0 : i32
    return %arg0, %c0_i32 : i32, i32
  }
  func.func @transform_1(%arg0: i32) -> (i32, i32) {
    %c0_i32 = arith.constant 0 : i32
    %c0_i32_0 = arith.constant 0 : i32
    %c0_i32_1 = arith.constant 0 : i32
    return %c0_i32, %c0_i32_0 : i32, i32
  }
  func.func @transform_2(%arg0: i32) -> (i32, i32) {
    %c0_i32 = arith.constant 0 : i32
    %c0_i32_0 = arith.constant 0 : i32
    return %arg0, %c0_i32 : i32, i32
  }
}

</mosaic_0001>

<bundles_post_ra>
// kernel: tpu_custom_call.1
= control target key start
LH: loop header
LB: loop body
LE: loop exit
PB: predicated region body
PF: predicated region fallthrough
CT: control target
= control target key end

     0   :  { %s163_s0 = inlined_call_operand.vmem [shape: f32[16,2], index: 0, kind: input, shape index: {}]   ;;  %s164_s1 = inlined_call_operand.vmem [shape: f32[2,128], index: 1, kind: input, shape index: {}]   ;;  %s165_s2 = inlined_call_operand.hbm [shape: f32[16,128], index: 2, kind: output, shape index: {}]  }
   0x1   :  { %v12_v0 = vld [vmem:[%s163_s0] sm:$0xff] }
   0x2   :  { %7 = vsyncpa [#allocation3], 0  ;;  %v119_v1 = vmov 0   ;;  %v120_v2 = vmov 1   ;;  %v13_v3 = vld [vmem:[%s163_s0 + $0x8] sm:$0xff]  ;;  %v16_v4 = vlaneseq  ;;  %s121_s0 = smov [#allocation2]  }
   0x3   :  { %89 = vset.pattern.permute.xlu1 %v119_v1  ;;  %88 = vset.pattern.permute.xlu0 %v120_v2  ;;  %v81_v6 = vld [vmem:[%s164_s1] ss:$0 sm:$0xff]  ;;  %v82_v9 = vld [vmem:[%s164_s1 + $0x1] ss:$0 sm:$0xff]  ;;  %s70_s17 = sshll.u32 %s121_s0, 4  ;;  %s71_s17 = int_to_ptr.vmem [resolvable:$true] %s70_s17 }
   0x4   :  { %32 = vperm.xlu1 %89, %v12_v0   ;;  %23 = vperm.xlu0 %88, %v12_v0   ;;  %v17_v5 = vand.u32 127, %v16_v4  ;;  %s95_s1 = scalar_lea.vmem %s71_s17, 256  ;;  %p100_p1 = scmp.lt.s32.totalorder %s71_s17, %s71_s17 }
   0x5   :  { %p96_p0 = scmp.ne.s32.totalorder %s71_s17, %s95_s1  ;;  %p101_p2 = scmp.lt.s32.totalorder %s95_s1, %s95_s1 }
   0x6   :  { %vm18_vm0 = vcmp.ge.s32.totalorder %v17_v5, 64 }
   0x7   :  { %p102_p3 = por %p101_p2, %p100_p1 }
   0x8   :  { %36 = vperm.xlu1 %89, %v13_v3   ;;  %28 = vperm.xlu0 %88, %v13_v3  }
   0x9   :  { %p103_p4 = pnand %p102_p3, %p96_p0 }
   0xc   :  { %90 = vset.pattern.permute.xlu0 %v119_v1 }
  0x83   :  { %v33_v7 = vpop.permute.xlu1 %32  ;;  %v24_v8 = vpop.permute.xlu0 %23 }
  0x84   :  { %v39_v10 = vsel %vm18_vm0, %v24_v8, %v33_v7 }
  0x85   :  { %v45_v11 = vsub.f32 %v39_v10, %v81_v6  ;;  %vm59_vm1 = vcmp.le.f32.partialorder %v39_v10, 10.0 }
  0x87   :  { %v51_v12 = vmul.f32 %v82_v9, %v45_v11  ;;  %v37_v13 = vpop.permute.xlu1 %36  ;;  %v29_v14 = vpop.permute.xlu0 %28 }
  0x88   :  { %v40_v15 = vsel %vm18_vm0, %v29_v14, %v37_v13 }
  0x89   :  { %v53_v16 = vmul.f32 %v51_v12, %v45_v11  ;;  %v46_v17 = vsub.f32 %v40_v15, %v81_v6  ;;  %vm60_vm2 = vcmp.le.f32.partialorder %v40_v15, 10.0 }
  0x8b   :  { %v55_v18 = vmul.f32 1.442695, %v53_v16  ;;  %v52_v19 = vmul.f32 %v82_v9, %v46_v17 }
  0x8d   :  { %91 = vpow2.f32 %v55_v18  ;;  %v54_v20 = vmul.f32 %v52_v19, %v46_v17 }
  0x8f   :  { %v57_v21 = vmul.f32 1.442695, %v54_v20 }
  0x91   :  { %93 = vpow2.f32 %v57_v21 }
  0x97   :  { %v92_v22 = vpop.eup %91 }
  0x98   :  { %v61_v23 = vsel %vm59_vm1, %v92_v22, 0.0 }
  0x99   :  { %63 = vst [vmem:[#allocation2] sm:$0xff] %v61_v23 }
  0x9b   :  { %v94_v24 = vpop.eup %93 }
  0x9c   :  { %v62_v25 = vsel %vm60_vm2, %v94_v24, 0.0 }
  0x9d   :  { %64 = vst [vmem:[#allocation2 + $0x8] sm:$0xff] %v62_v25 }
  0x9e   :  { %106 = shalt.err (!%p103_p4)
}
  0x9f   :  { %s107_s20 = scalar_lea.hbm %s165_s2, 256 }
  0xa0   :  { %p108_p5 = scmp.ne.s32.totalorder %s165_s2, %s107_s20  ;;  %p111_p6 = scmp.lt.u32.totalorder %s107_s20, %s165_s2 }
  0xa2   :  { %p113_p7 = pnand %p111_p6, %p108_p5 }
  0xa4   :  { %116 = shalt.err (!%p113_p7)
}
  0xa5   :  { %s122_s25 = smov 128   ;;  %s123_s26 = smov 8  }
  0xa6   :  { %76 = dma.vmem_to_hbm [thread:$0]  %s71_s17, 256, %s165_s2, [#allocation3], %s122_s25, %s122_s25, %s123_s26  }
  0xa7   :  { %117 = dma.done.wait [#allocation3], 256  }
  0xa8   :  { %118 = vsyncadd [#allocation3], 4294967040 }
  0xa9   :  { %80 = vsyncpa [#allocation3], 1 }

</bundles_post_ra>
